<compile_context>
chip_gen: v7x
topology: tpu7x:2x2x1
jax: 0.10.0
libtpu: 0.0.40
codegen_flags: <defaults>
</compile_context>

<pallas_src>
import jax
import jax.numpy as jnp
from jax import lax
from jax.experimental import pallas as pl
from jax.experimental.pallas import tpu as pltpu


def _cross_attention_kernel(q_ref, kv_ref,
                            wq_ref, bq_ref,
                            wkv_ref, bkv_ref,
                            o_ref,
                            k_scr, v_scr):
    """One (batch element, query tile) grid step.

    q_ref   : (1, block_q, H) bf16
    kv_ref  : (1, Skv,     H) bf16  (constant block index across qi -> dedup'd DMA)
    wq_ref  : (H, H)  bf16, attention scale pre-folded
    bq_ref  : (1, H)  f32,  attention scale pre-folded
    wkv_ref : (H, 2H) bf16, fused [wk | wv]
    bkv_ref : (1, 2H) f32,  fused [bk | bv]
    o_ref   : (1, block_q, H)
    k_scr, v_scr : (Skv, H) bf16 VMEM scratch, persists across qi steps.
    """
    h = q_ref.shape[-1]
    qi = pl.program_id(1)

    # ---- K/V projection: once per batch element, reused for all q tiles. ----
    @pl.when(qi == 0)
    def _project_kv():
        xkv = kv_ref[0]                                          # (Skv, H) bf16
        kv = jnp.dot(xkv, wkv_ref[...],
                     preferred_element_type=jnp.float32) + bkv_ref[...]
        k_scr[...] = kv[:, :h].astype(jnp.bfloat16)
        v_scr[...] = kv[:, h:].astype(jnp.bfloat16)

    # ---- Q projection for this query tile (scale folded into wq/bq). --------
    xq = q_ref[0]                                                # (block_q, H) bf16
    q = jnp.dot(xq, wq_ref[...],
                preferred_element_type=jnp.float32) + bq_ref[...]

    # scores = (q * scale) @ K^T : contraction over last dims, no XLU transpose.
    scores = lax.dot_general(q.astype(jnp.bfloat16), k_scr[...],
                             (((1,), (1,)), ((), ())),
                             preferred_element_type=jnp.float32)  # (block_q, Skv)

    # Numerically stable softmax in f32; normalization deferred past the PV
    # matmul (divide a (block_q, H) tile instead of scaling (block_q, Skv)).
    m = jnp.max(scores, axis=-1, keepdims=True)
    e = jnp.exp(scores - m)                                      # f32, in [0, 1]
    denom = jnp.sum(e, axis=-1, keepdims=True)                   # f32, exact

    out = jnp.dot(e.astype(jnp.bfloat16), v_scr[...],
                  preferred_element_type=jnp.float32)            # (block_q, H)
    out = out / denom                                            # exact divide
    o_ref[0] = out.astype(o_ref.dtype)


def _vmem_capacity_bytes():
    """Generation-aware VMEM capacity query (falls back to the v7x 64 MiB)."""
    try:
        cap = getattr(pltpu.get_tpu_info(), "vmem_capacity_bytes", None)
        if cap:
            return int(cap)
    except Exception:
        pass
    return 64 * 1024 * 1024


def cross_attention(query_feature, key_value_feature, params, *,
                    block_q=None, weight_dtype=jnp.bfloat16,
                    act_dtype=jnp.bfloat16, out_dtype=None):
    """query_feature: (B, Sq, H), key_value_feature: (B, Skv, H)."""
    B, Sq, H = query_feature.shape
    Bkv, Skv, Hkv = key_value_feature.shape
    assert Bkv == B and Hkv == H, "module uses a single hidden_size for both streams"
    out_dtype = query_feature.dtype if out_dtype is None else out_dtype
    out_isz = jnp.dtype(out_dtype).itemsize

    vmem_cap = _vmem_capacity_bytes()
    vmem_limit = int(vmem_cap * 0.8)          # ~20% headroom

    # --- tile selection ------------------------------------------------------
    # Bigger q tiles on 128 MiB parts (v5e/v6e); 256 on 64 MiB parts (v7x).
    if block_q is None:
        block_q = 512 if vmem_cap >= 96 * 1024 * 1024 else 256
    block_q = min(block_q, Sq)                # full-dim blocks are always legal

    def _est_bytes(bq):
        a = 2                                  # bf16 itemsize
        return (2 * bq * H * a                 # q block   (double buffered)
                + 2 * bq * H * out_isz         # out block (double buffered)
                + 2 * Skv * H * a              # kv block  (double buffered)
                + 3 * H * H * a                # wq + fused wkv (Buffered(1))
                + 2 * Skv * H * a              # K/V scratch
                + 2 * bq * Skv * 4             # scores + exp (f32)
                + 2 * Skv * H * 4)             # fused KV projection temp (f32)

    if Sq > block_q:                           # power-of-two targets; keeps %8==0
        while block_q > 64 and _est_bytes(block_q) > vmem_limit:
            block_q //= 2
    # TODO(synk): very large Skv*H still needs an inner flash/online-softmax
    # axis over Skv (v7x 64 MiB budget); not required for the shapes used here.

    grid = (B, pl.cdiv(Sq, block_q))           # ragged Sq -> partial last tile

    # --- host-side (one-time) parameter prep ---------------------------------
    scale = 1.0 / (float(Hkv) ** 0.5)
    wq_t = (params["wq"] * scale).T.astype(weight_dtype)          # [in, out]
    bq2 = (params["bq"] * scale).reshape(1, H).astype(jnp.float32)
    wkv_t = jnp.concatenate([params["wk"].T, params["wv"].T],
                            axis=1).astype(weight_dtype)          # (H, 2H)
    bkv2 = jnp.concatenate([params["bk"], params["bv"]],
                           axis=0).reshape(1, 2 * H).astype(jnp.float32)

    # bf16 activations at the boundary: halves HBM->VMEM bytes of the two
    # largest streamed blocks and removes a per-tile VPU cast.
    q_in = query_feature.astype(act_dtype)
    kv_in = key_value_feature.astype(act_dtype)

    # Constant-index weight/bias blocks: resident and single-buffered.
    const1 = lambda bi, qi: (0, 0)
    w_spec_q = pl.BlockSpec((H, H), const1, pipeline_mode=pl.Buffered(1))
    b_spec_q = pl.BlockSpec((1, H), const1, pipeline_mode=pl.Buffered(1))
    w_spec_kv = pl.BlockSpec((H, 2 * H), const1, pipeline_mode=pl.Buffered(1))
    b_spec_kv = pl.BlockSpec((1, 2 * H), const1, pipeline_mode=pl.Buffered(1))

    # TODO(synk): on v7x with B == 1 the serial "arbitrary" qi axis leaves one
    # TensorCore idle; a wrapper-level shard of qi across cores would fix that.
    return pl.pallas_call(
        _cross_attention_kernel,
        out_shape=jax.ShapeDtypeStruct((B, Sq, H), out_dtype),
        grid=grid,
        in_specs=[
            pl.BlockSpec((1, block_q, H), lambda bi, qi: (bi, qi, 0)),
            pl.BlockSpec((1, Skv, H), lambda bi, qi: (bi, 0, 0)),
            w_spec_q, b_spec_q,        # query Linear (scale folded)
            w_spec_kv, b_spec_kv,      # fused key+value Linear
        ],
        out_specs=pl.BlockSpec((1, block_q, H), lambda bi, qi: (bi, qi, 0)),
        scratch_shapes=[pltpu.VMEM((Skv, H), jnp.bfloat16),   # K scratch
                        pltpu.VMEM((Skv, H), jnp.bfloat16)],  # V scratch
        compiler_params=pltpu.CompilerParams(
            # qi must be the innermost "arbitrary" axis so the K/V scratch
            # written at qi == 0 stays valid for every query tile of a batch.
            dimension_semantics=("parallel", "arbitrary"),
            vmem_limit_bytes=vmem_limit,
        ),
    )(q_in, kv_in, wq_t, bq2, wkv_t, bkv2)


def _reference(query_feature, key_value_feature, params):
    def linear(x, w, b):
        return jnp.einsum("bsh,oh->bso", x, w) + b
    q = linear(query_feature, params["wq"], params["bq"])
    k = linear(key_value_feature, params["wk"], params["bk"])
    v = linear(key_value_feature, params["wv"], params["bv"])
    scale = key_value_feature.shape[-1] ** 0.5
    scores = jnp.einsum("bqh,bkh->bqk", q, k) / scale
    probs = jax.nn.softmax(scores, axis=-1)
    return jnp.einsum("bqk,bkh->bqh", probs, v)


def _make_params(key, H):
    k1, k2, k3, k4, k5, k6 = jax.random.split(key, 6)
    s = 1.0 / (H ** 0.5)
    return {
        "wq": jax.random.uniform(k1, (H, H), jnp.float32, -s, s),
        "bq": jax.random.uniform(k2, (H,), jnp.float32, -s, s),
        "wk": jax.random.uniform(k3, (H, H), jnp.float32, -s, s),
        "bk": jax.random.uniform(k4, (H,), jnp.float32, -s, s),
        "wv": jax.random.uniform(k5, (H, H), jnp.float32, -s, s),
        "bv": jax.random.uniform(k6, (H,), jnp.float32, -s, s),
    }


def _check(B, Sq, Skv, H, seed):
    key = jax.random.PRNGKey(seed)
    kp, kq, kkv = jax.random.split(key, 3)
    params = _make_params(kp, H)
    q_feat = jax.random.normal(kq, (B, Sq, H), jnp.float32)
    kv_feat = jax.random.normal(kkv, (B, Skv, H), jnp.float32)

    out = jax.block_until_ready(cross_attention(q_feat, kv_feat, params))
    ref = _reference(q_feat, kv_feat, params)
    assert out.shape == (B, Sq, H)
    # bf16 activations / MXU operands -> looser tolerance than pure f32.
    assert jnp.allclose(out, ref, atol=3e-2, rtol=3e-2), \
        f"mismatch vs reference at shape {(B, Sq, Skv, H)}"


if __name__ == "__main__":
    # Toy shape (single q tile per batch element).
    _check(B=2, Sq=8, Skv=8, H=32, seed=0)
    # Moderate aligned shape (q tiling path; K/V projected once per batch
    # element and reused across q tiles when the grid has >1 q tile).
    _check(B=2, Sq=512, Skv=256, H=128, seed=0)
    # Ragged Sq / Skv (pl.cdiv grid, partial last q tile on 64 MiB parts).
    _check(B=1, Sq=300, Skv=160, H=128, seed=1)
    print("KERNEL_OK")
</pallas_src>

<mosaic_0001>
module attributes {stable_mosaic.version = 11 : i64} {
  func.func @_cross_attention_kernel(%arg0: i32, %arg1: i32, %arg2: memref<1x8x32xbf16, #tpu.memory_space<vmem>>, %arg3: memref<1x8x32xbf16, #tpu.memory_space<vmem>>, %arg4: memref<32x32xbf16, #tpu.memory_space<vmem>>, %arg5: memref<1x32xf32, #tpu.memory_space<vmem>>, %arg6: memref<32x64xbf16, #tpu.memory_space<vmem>>, %arg7: memref<1x64xf32, #tpu.memory_space<vmem>>, %arg8: memref<1x8x32xf32, #tpu.memory_space<vmem>>, %arg9: memref<8x32xbf16, #tpu.memory_space<vmem>>, %arg10: memref<8x32xbf16, #tpu.memory_space<vmem>>) attributes {dimension_semantics = [#tpu.dimension_semantics<parallel>, #tpu.dimension_semantics<arbitrary>], iteration_bounds = array<i64: 2, 1>, scalar_prefetch = 0 : i64, scratch_operands = 2 : i64, tpu.core_type = #tpu.core_type<tc>, window_params = [{transform_indices = @transform_0, window_bounds = array<i64: 1, 8, 32>}, {transform_indices = @transform_1, window_bounds = array<i64: 1, 8, 32>}, {pipeline_mode = #tpu.pipeline_mode<synchronous>, transform_indices = @transform_2, window_bounds = array<i64: 32, 32>}, {pipeline_mode = #tpu.pipeline_mode<synchronous>, transform_indices = @transform_3, window_bounds = array<i64: 1, 32>}, {pipeline_mode = #tpu.pipeline_mode<synchronous>, transform_indices = @transform_4, window_bounds = array<i64: 32, 64>}, {pipeline_mode = #tpu.pipeline_mode<synchronous>, transform_indices = @transform_5, window_bounds = array<i64: 1, 64>}, {transform_indices = @transform_6, window_bounds = array<i64: 1, 8, 32>}]} {
    %c0_i32 = arith.constant 0 : i32
    %0 = arith.cmpi eq, %arg1, %c0_i32 : i32
    %1 = arith.extui %0 : i1 to i32
    %c0_i32_0 = arith.constant 0 : i32
    %2 = arith.cmpi ne, %1, %c0_i32_0 : i32
    scf.if %2 {
      %c0_18 = arith.constant 0 : index
      %c0_19 = arith.constant 0 : index
      %c0_20 = arith.constant 0 : index
      %28 = vector.load %arg3[%c0_18, %c0_19, %c0_20] : memref<1x8x32xbf16, #tpu.memory_space<vmem>>, vector<1x8x32xbf16>
      %29 = vector.shape_cast %28 : vector<1x8x32xbf16> to vector<8x32xbf16>
      %c0_21 = arith.constant 0 : index
      %c0_22 = arith.constant 0 : index
      %30 = vector.load %arg6[%c0_21, %c0_22] : memref<32x64xbf16, #tpu.memory_space<vmem>>, vector<32x64xbf16>
      %cst_23 = arith.constant dense<0.000000e+00> : vector<8x64xf32>
      %31 = tpu.matmul %29, %30, %cst_23 {dimension_numbers = #tpu.dot_dimension_numbers<[1], [0], [0], [1], [0, 0, 1, 1], [], []>} : vector<8x32xbf16>, vector<32x64xbf16>, vector<8x64xf32> -> vector<8x64xf32>
      %c0_24 = arith.constant 0 : index
      %c0_25 = arith.constant 0 : index
      %32 = vector.load %arg7[%c0_24, %c0_25] : memref<1x64xf32, #tpu.memory_space<vmem>>, vector<1x64xf32>
      %33 = vector.broadcast %32 : vector<1x64xf32> to vector<8x64xf32>
      %34 = arith.addf %31, %33 : vector<8x64xf32>
      %35 = vector.extract_strided_slice %34 {offsets = [0, 0], sizes = [8, 32], strides = [1, 1]} : vector<8x64xf32> to vector<8x32xf32>
      %36 = arith.truncf %35 : vector<8x32xf32> to vector<8x32xbf16>
      %c0_26 = arith.constant 0 : index
      %c0_27 = arith.constant 0 : index
      %37 = vector.load %arg9[%c0_26, %c0_27] : memref<8x32xbf16, #tpu.memory_space<vmem>>, vector<8x32xbf16>
      tpu.vector_store %arg9[%c0_26, %c0_27], %36 {strides = array<i32>} : memref<8x32xbf16, #tpu.memory_space<vmem>>, vector<8x32xbf16>,
      %38 = vector.extract_strided_slice %34 {offsets = [0, 32], sizes = [8, 32], strides = [1, 1]} : vector<8x64xf32> to vector<8x32xf32>
      %39 = arith.truncf %38 : vector<8x32xf32> to vector<8x32xbf16>
      %c0_28 = arith.constant 0 : index
      %c0_29 = arith.constant 0 : index
      %40 = vector.load %arg10[%c0_28, %c0_29] : memref<8x32xbf16, #tpu.memory_space<vmem>>, vector<8x32xbf16>
      tpu.vector_store %arg10[%c0_28, %c0_29], %39 {strides = array<i32>} : memref<8x32xbf16, #tpu.memory_space<vmem>>, vector<8x32xbf16>,
    } else {
    }
    %c0 = arith.constant 0 : index
    %c0_1 = arith.constant 0 : index
    %c0_2 = arith.constant 0 : index
    %3 = vector.load %arg2[%c0, %c0_1, %c0_2] : memref<1x8x32xbf16, #tpu.memory_space<vmem>>, vector<1x8x32xbf16>
    %4 = vector.shape_cast %3 : vector<1x8x32xbf16> to vector<8x32xbf16>
    %c0_3 = arith.constant 0 : index
    %c0_4 = arith.constant 0 : index
    %5 = vector.load %arg4[%c0_3, %c0_4] : memref<32x32xbf16, #tpu.memory_space<vmem>>, vector<32x32xbf16>
    %cst = arith.constant dense<0.000000e+00> : vector<8x32xf32>
    %6 = tpu.matmul %4, %5, %cst {dimension_numbers = #tpu.dot_dimension_numbers<[1], [0], [0], [1], [0, 0, 1, 1], [], []>} : vector<8x32xbf16>, vector<32x32xbf16>, vector<8x32xf32> -> vector<8x32xf32>
    %c0_5 = arith.constant 0 : index
    %c0_6 = arith.constant 0 : index
    %7 = vector.load %arg5[%c0_5, %c0_6] : memref<1x32xf32, #tpu.memory_space<vmem>>, vector<1x32xf32>
    %8 = vector.broadcast %7 : vector<1x32xf32> to vector<8x32xf32>
    %9 = arith.addf %6, %8 : vector<8x32xf32>
    %10 = arith.truncf %9 : vector<8x32xf32> to vector<8x32xbf16>
    %c0_7 = arith.constant 0 : index
    %c0_8 = arith.constant 0 : index
    %11 = vector.load %arg9[%c0_7, %c0_8] : memref<8x32xbf16, #tpu.memory_space<vmem>>, vector<8x32xbf16>
    %cst_9 = arith.constant dense<0.000000e+00> : vector<8x8xf32>
    %12 = tpu.matmul %10, %11, %cst_9 {dimension_numbers = #tpu.dot_dimension_numbers<[1], [1], [0], [0], [0, 0, 1, 0], [], []>} : vector<8x32xbf16>, vector<8x32xbf16>, vector<8x8xf32> -> vector<8x8xf32>
    %cst_10 = arith.constant dense<0xFF800000> : vector<8xf32>
    %13 = vector.multi_reduction <maximumf>, %12, %cst_10 [1] : vector<8x8xf32> to vector<8xf32>
    %14 = vector.shape_cast %13 : vector<8xf32> to vector<8x1xf32>
    %15 = vector.broadcast %14 : vector<8x1xf32> to vector<8x8xf32>
    %16 = arith.subf %12, %15 : vector<8x8xf32>
    %17 = math.exp %16 : vector<8x8xf32>
    %cst_11 = arith.constant dense<0.000000e+00> : vector<8xf32>
    %18 = vector.multi_reduction <add>, %17, %cst_11 [1] : vector<8x8xf32> to vector<8xf32>
    %19 = vector.shape_cast %18 : vector<8xf32> to vector<8x1xf32>
    %20 = arith.truncf %17 : vector<8x8xf32> to vector<8x8xbf16>
    %c0_12 = arith.constant 0 : index
    %c0_13 = arith.constant 0 : index
    %21 = vector.load %arg10[%c0_12, %c0_13] : memref<8x32xbf16, #tpu.memory_space<vmem>>, vector<8x32xbf16>
    %cst_14 = arith.constant dense<0.000000e+00> : vector<8x32xf32>
    %22 = tpu.matmul %20, %21, %cst_14 {dimension_numbers = #tpu.dot_dimension_numbers<[1], [0], [0], [1], [0, 0, 1, 1], [], []>} : vector<8x8xbf16>, vector<8x32xbf16>, vector<8x32xf32> -> vector<8x32xf32>
    %23 = vector.broadcast %19 : vector<8x1xf32> to vector<8x32xf32>
    %24 = arith.divf %22, %23 : vector<8x32xf32>
    %c0_15 = arith.constant 0 : index
    %c0_16 = arith.constant 0 : index
    %c0_17 = arith.constant 0 : index
    %25 = vector.load %arg8[%c0_15, %c0_16, %c0_17] : memref<1x8x32xf32, #tpu.memory_space<vmem>>, vector<1x8x32xf32>
    %26 = vector.shape_cast %25 : vector<1x8x32xf32> to vector<8x32xf32>
    %27 = vector.shape_cast %24 : vector<8x32xf32> to vector<1x8x32xf32>
    tpu.vector_store %arg8[%c0_15, %c0_16, %c0_17], %27 {strides = array<i32>} : memref<1x8x32xf32, #tpu.memory_space<vmem>>, vector<1x8x32xf32>,
    return
  }
  func.func @transform_0(%arg0: i32, %arg1: i32) -> (i32, i32, i32) {
    %c0_i32 = arith.constant 0 : i32
    %c0_i32_0 = arith.constant 0 : i32
    return %arg0, %arg1, %c0_i32 : i32, i32, i32
  }
  func.func @transform_1(%arg0: i32, %arg1: i32) -> (i32, i32, i32) {
    %c0_i32 = arith.constant 0 : i32
    %c0_i32_0 = arith.constant 0 : i32
    %c0_i32_1 = arith.constant 0 : i32
    return %arg0, %c0_i32, %c0_i32_0 : i32, i32, i32
  }
  func.func @transform_2(%arg0: i32, %arg1: i32) -> (i32, i32) {
    %c0_i32 = arith.constant 0 : i32
    %c0_i32_0 = arith.constant 0 : i32
    %c0_i32_1 = arith.constant 0 : i32
    return %c0_i32, %c0_i32_0 : i32, i32
  }
  func.func @transform_3(%arg0: i32, %arg1: i32) -> (i32, i32) {
    %c0_i32 = arith.constant 0 : i32
    %c0_i32_0 = arith.constant 0 : i32
    %c0_i32_1 = arith.constant 0 : i32
    return %c0_i32, %c0_i32_0 : i32, i32
  }
  func.func @transform_4(%arg0: i32, %arg1: i32) -> (i32, i32) {
    %c0_i32 = arith.constant 0 : i32
    %c0_i32_0 = arith.constant 0 : i32
    %c0_i32_1 = arith.constant 0 : i32
    return %c0_i32, %c0_i32_0 : i32, i32
  }
  func.func @transform_5(%arg0: i32, %arg1: i32) -> (i32, i32) {
    %c0_i32 = arith.constant 0 : i32
    %c0_i32_0 = arith.constant 0 : i32
    %c0_i32_1 = arith.constant 0 : i32
    return %c0_i32, %c0_i32_0 : i32, i32
  }
  func.func @transform_6(%arg0: i32, %arg1: i32) -> (i32, i32, i32) {
    %c0_i32 = arith.constant 0 : i32
    %c0_i32_0 = arith.constant 0 : i32
    return %arg0, %arg1, %c0_i32 : i32, i32, i32
  }
}

</mosaic_0001>

<bundles_post_ra>
// kernel: tpu_custom_call.1
= control target key start
LH: loop header
LB: loop body
LE: loop exit
PB: predicated region body
PF: predicated region fallthrough
CT: control target
= control target key end

     0   :  { %s1484_s0 = inlined_call_operand.hbm [shape: bf16[2,8,32], index: 0, kind: input, shape index: {}]   ;;  %s1485_s1 = inlined_call_operand.hbm [shape: bf16[2,8,32], index: 1, kind: input, shape index: {}]   ;;  %s1486_s2 = inlined_call_operand.hbm [shape: bf16[32,32], index: 2, kind: input, shape index: {}]   ;;  %s1487_s3 = inlined_call_operand.vmem [shape: f32[1,32], index: 3, kind: input, shape index: {}]   ;;  %s1488_s4 = inlined_call_operand.hbm [shape: bf16[32,64], index: 4, kind: input, shape index: {}]   ;;  %s1489_s5 = inlined_call_operand.vmem [shape: f32[1,64], index: 5, kind: input, shape index: {}]   ;;  %s1490_s6 = inlined_call_operand.hbm [shape: f32[2,8,32], index: 6, kind: output, shape index: {}]  }
   0x1   :  { %1497 = sst [smem:[#allocation21_spill]] %s1486_s2 }
   0x2   :  { %1498 = sst [smem:[#allocation22_spill]] %s1488_s4 }
   0x3   :  { %11 = vsyncpa [#allocation5], 0 }
   0x4   :  { %13 = vsyncpa [#allocation5 + $0x1], 0 }
   0x5   :  { %14 = vsyncpa [#allocation8], 0 }
   0x6   :  { %16 = vsyncpa [#allocation8 + $0x1], 0 }
   0x7   :  { %17 = vsyncpa [#allocation11], 0 }
   0x8   :  { %18 = vsyncpa [#allocation6], 0 }
   0x9   :  { %20 = vsyncpa [#allocation6 + $0x1], 0  ;;  %s1176_s21 = smov 0   ;;  %s1178_s22 = smov 0  }
   0xa   :  { %s1180_s23 = smov 0   ;;  %s1182_s24 = smov 0  }
   0xb   :  { %s1184_s25 = smov 0   ;;  %s1186_s26 = smov 0  }
   0xc LB: > { %1499 = sst [smem:[#allocation18_spill]] %s1125_s25  ;;  %s1207_s27 = sadd.s32 4294967295, %s1129_s26   ;;  %s1129_s26 = sphi %s1186_s26, %s26_s26   ;;  %s1125_s25 = sphi %s1184_s25, %s1522_s25   ;;  %s1121_s24 = sphi %s1182_s24, %s1521_s24   ;;  %s1117_s23 = sphi %s1180_s23, %s1525_s23   ;;  %s1113_s22 = sphi %s1178_s22, %s1524_s22   ;;  %s1109_s21 = sphi %s1176_s21, %s1523_s21  }
   0xd   : > { %s749_s28 = sadd.s32 4294967294, %s1129_s26   ;;  %p60_p0 = scmp.ne.s32.totalorder %s1113_s22, %s1109_s21 }
   0xe   : > { %p1491_p1 = scmp.eq.s32.totalorder %s1207_s27, 0  ;;  %p202_p3 = scmp.eq.s32.totalorder %s749_s28, 1 }
   0xf   : > { %p750_p5 = scmp.ge.s32.totalorder %s1129_s26, 1  ;;  %p209_p7 = scmp.lt.s32.totalorder %s1129_s26, 3 }
  0x10   : > { %p1216_p4 = por %p1491_p1, %p60_p0  ;;  %p1221_p6 = por %p202_p3, %p60_p0 }
  0x11   : > { %p1226_p8 = pnand %p750_p5, %p209_p7  ;;  %s1131_s8 = smov [#allocation9]  }
  0x12   : > { %s1500_s29 = scalar_select %p1216_p4, 1, 0 }
  0x13   : > { %s1501_s30 = scalar_select %p1221_p6, 1, 0 }
  0x14   : > { %s1502_s7 = scalar_select %p1226_p8, 1, 0 }
  0x15   : > { %s221_s9 = sshll.u32 %s1131_s8, 4  ;;  %p832_p9 = pneg %p1226_p8  ;;  %s1230_s9 = int_to_ptr.vmem [resolvable:$true] %s221_s9 }
  0x16   : > { %s1132_s11 = smov [#allocation10]   ;;  %s1504_s2 = sld [smem:[#allocation21_spill]] }
  0x17   : > { %p1237_p11 = pnand %p832_p9, %p1491_p1  ;;  %s237_s12 = sshll.u32 %s1132_s11, 4  ;;  %s1241_s12 = int_to_ptr.vmem [resolvable:$true] %s237_s12 }
  0x19   : > { %p921_p13 = pneg %p1237_p11 }
  0x1c   : > { %s919_s15 = scalar_lea.hbm %s1504_s2, 256 }
  0x1d   : > { %p920_p12 = scmp.ne.s32.totalorder %s1504_s2, %s919_s15  ;;  %p926_p5 = scmp.lt.u32.totalorder %s919_s15, %s1504_s2 }
  0x1f   : > { %p922_p0 = pnand %p921_p13, %p920_p12 }
  0x21   : > { %p923_p3 = pneg %p922_p0 }
  0x23   : > { %p928_p7 = pnand %p926_p5, %p923_p3 }
  0x25   : > { %931 = shalt.err (!%p928_p7)
}
  0x26   : > { %s932_s20 = scalar_lea.vmem %s1230_s9, 256  ;;  %p940_p2 = scmp.lt.s32.totalorder %s1230_s9, %s1230_s9 }
  0x27   : > { %p933_p9 = scmp.ne.s32.totalorder %s1230_s9, %s932_s20  ;;  %p941_p12 = scmp.lt.s32.totalorder %s932_s20, %s932_s20 }
  0x29   : > { %p935_p10 = pnand %p933_p9, %p921_p13  ;;  %p942_p0 = por %p941_p12, %p940_p2 }
  0x2b   : > { %p936_p1 = pneg %p935_p10 }
  0x2d   : > { %p943_p6 = pnand %p942_p0, %p936_p1 }
  0x2f   : > { %946 = shalt.err (!%p943_p6)
}
  0x30   : > { %s1133_s28 = smov 64   ;;  %s1134_s8 = smov 4  }
  0x31   : > { %835 = dma.hbm_to_vmem [thread:$0]  (!%p1237_p11), %s1504_s2, 256, %s1230_s9, [#allocation8], %s1133_s28, %s1133_s28, %s1134_s8  }
  0x32   : > { %s1505_s4 = sld [smem:[#allocation22_spill]] }
  0x38   : > { %s947_s16 = scalar_lea.hbm %s1505_s4, 256 }
  0x39   : > { %p948_p2 = scmp.ne.s32.totalorder %s1505_s4, %s947_s16  ;;  %p954_p10 = scmp.lt.u32.totalorder %s947_s16, %s1505_s4 }
  0x3b   : > { %p950_p1 = pnand %p948_p2, %p921_p13 }
  0x3d   : > { %p951_p6 = pneg %p950_p1 }
  0x3f   : > { %p956_p3 = pnand %p954_p10, %p951_p6 }
  0x41   : > { %959 = shalt.err (!%p956_p3)
}
  0x42   : > { %s960_s9 = scalar_lea.vmem %s1241_s12, 256  ;;  %p968_p12 = scmp.lt.s32.totalorder %s1241_s12, %s1241_s12 }
  0x43   : > { %p961_p5 = scmp.ne.s32.totalorder %s1241_s12, %s960_s9  ;;  %p969_p0 = scmp.lt.s32.totalorder %s960_s9, %s960_s9 }
  0x45   : > { %p963_p7 = pnand %p961_p5, %p921_p13  ;;  %p970_p2 = por %p969_p0, %p968_p12 }
  0x47   : > { %p964_p9 = pneg %p963_p7 }
  0x49   : > { %p971_p1 = pnand %p970_p2, %p964_p9 }
  0x4b   : > { %974 = shalt.err (!%p971_p1)
}
  0x4c   : > { %838 = dma.hbm_to_vmem [thread:$0]  (!%p1237_p11), %s1505_s4, 256, %s1241_s12, [#allocation11], %s1133_s28, %s1133_s28, %s1134_s8  }
  0x4d   : > { %s38_s14 = sadd.s32 1, %s1125_s25  ;;  %s47_s15 = sadd.s32 1, %s1117_s23 }
  0x4e   : > { %p40_p13 = scmp.ge.s32.totalorder %s38_s14, 2  ;;  %p54_p6 = scmp.ne.s32.totalorder %s1117_s23, %s1113_s22 }
  0x4f   : > { %p55_p10 = scmp.eq.s32.totalorder %s1129_s26, 0  ;;  %p852_p3 = scmp.lt.s32.totalorder %s1129_s26, 2 }
  0x50   : > { %s1527_s14 = smov (%p40_p13, %s38_s14), 0  ;;  %p1507_p7 = scmp.eq.s32.totalorder %s1207_s27, 1 }
  0x51   : > { %1506 = sst [smem:[#allocation19_spill]] %s1527_s14  ;;  %p56_p5 = por %p55_p10, %p54_p6 }
  0x52   : > { %p1305_p9 = por %p1507_p7, %p54_p6  ;;  %s42_s16 = ssub.s32 %s1125_s25, %s1527_s14 }
  0x53   : > { %s254_s17 = sand.u32 1, %s1117_s23   ;;  %p45_p12 = scmp.eq.s32.totalorder %s42_s16, 0 }
  0x54   : > { %s1508_s10 = scalar_select %p1305_p9, 1, 0 }
  0x55   : > { %s1312_s12 = sshll.u32 %s254_s17, 2  ;;  %s755_s28 = sshll.u32 %s1125_s25, 6 }
  0x56   : > { %s1316_s8 = scalar_select %p45_p12, %s1117_s23, %s47_s15  }
  0x57   : > { %s1321_s20 = scalar_lea.hbm %s1484_s0, %s755_s28  ;;  %s258_s9 = scalar_lea.vmem [#allocation4], %s1312_s12 }
  0x58   : > { %1509 = sst [smem:[#allocation20_spill]] %s1316_s8  ;;  %s266_s11 = sshll.u32 %s258_s9, 4  ;;  %s1330_s11 = int_to_ptr.vmem [resolvable:$true] %s266_s11 }
  0x59   : > { %p1326_p11 = pnand %p852_p3, %p56_p5  ;;  %s1335_s18 = scalar_lea.hbm %s1485_s1, %s755_s28 }
  0x5a   : > { %s255_s19 = scalar_lea.sflag [#allocation5], %s254_s17  ;;  %s975_s2 = scalar_lea.hbm %s1321_s20, 64 }
  0x5b   : > { %p976_p0 = scmp.ne.s32.totalorder %s1321_s20, %s975_s2  ;;  %p977_p2 = pneg %p1326_p11 }
  0x5c   : > { %s980_s14 = scalar_lea.hbm %s1484_s0, 128  ;;  %p981_p6 = scmp.lt.u32.totalorder %s1321_s20, %s1484_s0 }
  0x5d   : > { %p978_p1 = pnand %p977_p2, %p976_p0  ;;  %p982_p10 = scmp.lt.u32.totalorder %s980_s14, %s975_s2 }
  0x5e   : > { %p984_p5 = scmp.lt.u32.totalorder %s975_s2, %s1321_s20 }
  0x5f   : > { %p979_p13 = pneg %p978_p1  ;;  %p983_p3 = por %p982_p10, %p981_p6 }
  0x61   : > { %p985_p7 = por %p984_p5, %p983_p3 }
  0x63   : > { %p986_p12 = pnand %p985_p7, %p979_p13 }
  0x65   : > { %989 = shalt.err (!%p986_p12)
}
  0x66   : > { %s990_s17 = scalar_lea.vmem %s1330_s11, 64  ;;  %s1135_s4 = smov [#allocation4]  }
  0x67   : > { %p991_p0 = scmp.ne.s32.totalorder %s1330_s11, %s990_s17  ;;  %s995_s28 = sshll.u32 %s1135_s4, 4  ;;  %s996_s28 = int_to_ptr.vmem [resolvable:$false] %s995_s28 }
  0x68   : > { %s997_s25 = scalar_lea.vmem %s996_s28, 128  ;;  %p998_p4 = scmp.lt.s32.totalorder %s1330_s11, %s996_s28 }
  0x69   : > { %p993_p1 = pnand %p991_p0, %p977_p2  ;;  %p999_p6 = scmp.lt.s32.totalorder %s997_s25, %s990_s17 }
  0x6b   : > { %p994_p9 = pneg %p993_p1  ;;  %p1000_p10 = por %p999_p6, %p998_p4 }
  0x6d   : > { %p1001_p3 = pnand %p1000_p10, %p994_p9 }
  0x6f   : > { %1004 = shalt.err (!%p1001_p3)
}
  0x70   : > { %842 = dma.hbm_to_vmem [thread:$0]  (!%p1326_p11), %s1321_s20, 64, %s1330_s11, %s255_s19  }
  0x71   : > { %s273_s2 = sand.u32 1, %s1129_s26   ;;  %s277_s14 = scalar_lea.vmem [#allocation7], %s1312_s12 }
  0x72   : > { %s284_s8 = sshll.u32 %s277_s14, 4  ;;  %s274_s15 = scalar_lea.sflag [#allocation8], %s273_s2  ;;  %s285_s8 = int_to_ptr.vmem [resolvable:$true] %s284_s8 }
  0x73   : > { %s1005_s16 = scalar_lea.hbm %s1335_s18, 64  ;;  %s1010_s4 = scalar_lea.hbm %s1485_s1, 128 }
  0x74   : > { %p1006_p4 = scmp.ne.s32.totalorder %s1335_s18, %s1005_s16  ;;  %p1011_p5 = scmp.lt.u32.totalorder %s1335_s18, %s1485_s1 }
  0x75   : > { %p1012_p7 = scmp.lt.u32.totalorder %s1010_s4, %s1005_s16  ;;  %p1014_p0 = scmp.lt.u32.totalorder %s1005_s16, %s1335_s18 }
  0x76   : > { %p1008_p9 = pnand %p1006_p4, %p977_p2 }
  0x77   : > { %p1013_p12 = por %p1012_p7, %p1011_p5 }
  0x78   : > { %p1009_p13 = pneg %p1008_p9 }
  0x79   : > { %p1015_p1 = por %p1014_p0, %p1013_p12 }
  0x7b   : > { %p1016_p6 = pnand %p1015_p1, %p1009_p13 }
  0x7d   : > { %1019 = shalt.err (!%p1016_p6)
}
  0x7e   : > { %s1020_s12 = scalar_lea.vmem %s285_s8, 64  ;;  %s1136_s20 = smov [#allocation7]  }
  0x7f   : > { %p1021_p10 = scmp.ne.s32.totalorder %s285_s8, %s1020_s12  ;;  %s1025_s11 = sshll.u32 %s1136_s20, 4  ;;  %s1026_s11 = int_to_ptr.vmem [resolvable:$false] %s1025_s11 }
  0x80   : > { %s1027_s19 = scalar_lea.vmem %s1026_s11, 128  ;;  %p1028_p9 = scmp.lt.s32.totalorder %s285_s8, %s1026_s11 }
  0x81   : > { %p1023_p3 = pnand %p1021_p10, %p977_p2  ;;  %p1029_p8 = scmp.lt.s32.totalorder %s1027_s19, %s1020_s12 }
  0x83   : > { %p1024_p4 = pneg %p1023_p3  ;;  %p1030_p5 = por %p1029_p8, %p1028_p9 }
  0x85   : > { %p1031_p7 = pnand %p1030_p5, %p1024_p4 }
  0x87   : > { %1034 = shalt.err (!%p1031_p7)
}
  0x88   : > { %845 = dma.hbm_to_vmem [thread:$0]  (!%p1326_p11), %s1335_s18, 64, %s285_s8, %s274_s15  }
  0x89   : > { %p1511_p13 = scmp.ne.s32.totalorder %s1502_s7, 0 }
  0x8a   : > { %s1386_s2 = sand.u32 (!%p1511_p13), 1, %s1113_s22   ;;  %p1512_p8 = scmp.ne.s32.totalorder (!%p1511_p13), %s1500_s29, 0 }
  0x8b   : > { %293 = sbr.rel (%p1511_p13) target bundleno = 999 (0x3e7), region = 44  ;;  %s759_s14 = sshll.u32 (!%p1511_p13), %s1386_s2, 2 }
  0x8c   : > { %s296_s16 = scalar_lea.sflag (!%p1511_p13), [#allocation5], %s1386_s2  ;;  %s1390_s9 = scalar_lea.vmem (!%p1511_p13), [#allocation4], %s759_s14 }
  0x92   : > { %1088 = dma.done.wait (%p1512_p8), %s296_s16, 64  }
  0x93   : > { %1090 = vsyncadd (%p1512_p8), %s296_s16, 4294967232  ;;  %s304_s13 = sand.u32 1, %s1207_s27   ;;  %s308_s18 = scalar_lea.vmem [#allocation7], %s759_s14 }
  0x94   : > { %s305_s7 = scalar_lea.sflag [#allocation8], %s304_s13 }
  0x95   : > { %1092 = dma.done.wait (%p1512_p8), %s305_s7, 64  }
  0x96   : > { %1094 = vsyncadd (%p1512_p8), %s305_s7, 4294967232  ;;  %p1513_p11 = scmp.eq.s32.totalorder %s1207_s27, 0 }
  0x98   : > { %1096 = dma.done.wait (%p1513_p11), [#allocation8], 256   ;;  %p1514_p2 = pmov %p1513_p11 }
  0x9a   : > { %1098 = vsyncadd (%p1514_p2), [#allocation8], 4294967040  ;;  %p1515_p12 = pmov %p1514_p2 }
  0x9b   : > { %p1516_p0 = pmov %p1514_p2 }
  0x9c   : > { %1100 = dma.done.wait (%p1515_p12), [#allocation11], 256  }
  0x9d   : > { %1102 = vsyncadd (%p1516_p0), [#allocation11], 4294967040  ;;  %v1137_v0 = vmov 0.0   ;;  %vm1138_vm0 = vmmov 0   ;;  %v911_v1 = vld [vmem:[#allocation10] sm:$0xff]   ;;  %v912_v2 = vld [vmem:[#allocation10 + $0x8] sm:$0xff]  }
  0x9e   : > { %790 = vmatprep.subr.bf16.mxu0 %v1137_v0  ;;  %794 = vmatprep.mubr.msk.bf16.mxu0 %vm1138_vm0, %v1137_v0  ;;  %v913_v3 = vld [vmem:[#allocation9] sm:$0xff]   ;;  %v914_v4 = vld [vmem:[#allocation9 + $0x8] sm:$0xff]   ;;  %v355_v5 = vld [vmem:[%s308_s18] sm:$0xf]  ;;  %vm379_vm1 = vcmask 261120   ;;  %vm424_vm2 = vcmask 257024  }
  0x9f   : > { %798 = vmatprep.subr.bf16.mxu1 %v1137_v0  ;;  %802 = vmatprep.mubr.msk.bf16.mxu1 %vm1138_vm0, %v1137_v0  ;;  %v433_v6 = vld [vmem:[%s1390_s9] sm:$0xf]  ;;  %v764_v7 = vld [vmem:[%s1489_s5] ss:$0 sm:$0xff]  ;;  %vm549_vm3 = vcmask 64512   ;;  %s1139_s17 = smov 96  }
  0xa0   : > { %791 = vmatpush3.bf16.msra.mxu0 %v911_v1  ;;  %799 = vmatpush3.bf16.msra.mxu1 %v913_v3  ;;  %v769_v18 = vld [vmem:[%s1487_s3] ss:$0 sm:$0xff]  ;;  %vm564_vm4 = vcmask 1043456   ;;  %s763_s4 = sshll.u32 %s1386_s2, 3  ;;  %s776_s28 = sshll.u32 %s1121_s24, 7 }
  0xa1   : > { %792 = vmatprep.subr.bf16.mxu0 %v1137_v0  ;;  %800 = vmatprep.subr.bf16.mxu1 %v1137_v0  ;;  %s349_s25 = scalar_lea.vmem [#allocation12], %s763_s4  ;;  %s1434_s19 = scalar_lea.hbm %s1490_s6, %s776_s28 }
  0xa2   : > { %s626_s12 = sshll.u32 %s349_s25, 4  ;;  %s612_s24 = scalar_lea.sflag [#allocation6], %s1386_s2  ;;  %s1436_s12 = int_to_ptr.vmem [resolvable:$true] %s626_s12 }
  0xa3   : > { %s1035_s14 = scalar_lea.vmem %s1436_s12, 128  ;;  %p1517_p6 = scmp.ne.s32.totalorder %s1508_s10, 0 }
  0xa4   : > { %793 = vmatpush3.bf16.msra.mxu0 %v912_v2  ;;  %801 = vmatpush3.bf16.msra.mxu1 %v914_v4  ;;  %p1036_p1 = scmp.ne.s32.totalorder %s1436_s12, %s1035_s14  ;;  %s1140_s16 = smov [#allocation12]  }
  0xa5   : > { %806 = vmatprep.subr.bf16.mxu0 %v1137_v0  ;;  %812 = vmatprep.subr.bf16.mxu1 %v1137_v0  ;;  %s1039_s9 = sshll.u32 %s1140_s16, 4  ;;  %s1040_s9 = int_to_ptr.vmem [resolvable:$false] %s1039_s9 }
  0xa6   : > { %p1037_p10 = pnand %p1036_p1, %p1517_p6  ;;  %s1041_s13 = scalar_lea.vmem %s1040_s9, 256 }
  0xa7   : > { %795 = vmatmul.mubr.msk.bf16.vlgmr.msra.gmra.mrb[0].mxu0 %vm379_vm1, %v355_v5  ;;  %803 = vmatmul.mubr.msk.bf16.vlgmr.msra.gmra.mrb[0].mxu1 %vm379_vm1, %v433_v6  ;;  %p1042_p4 = scmp.lt.s32.totalorder %s1436_s12, %s1040_s9  ;;  %p1043_p9 = scmp.lt.s32.totalorder %s1041_s13, %s1035_s14 }
  0xa8   : > { %808 = vmatprep.mubr.msk.bf16.mxu0 %vm1138_vm0, %v1137_v0  ;;  %814 = vmatprep.mubr.msk.bf16.mxu1 %vm1138_vm0, %v1137_v0  ;;  %p1038_p3 = pneg %p1037_p10 }
  0xa9   : > { %p1044_p5 = por %p1043_p9, %p1042_p4 }
  0xab   : > { %p1045_p7 = pnand %p1044_p5, %p1038_p3 }
 0x17a   : > { %v417_v8 = vpop.f32.mrb[0].mxu0  ;;  %v495_v14 = vpop.f32.mrb[0].mxu1 }
 0x17b   : > { %v418_v9 = vadd.f32 %v764_v7, %v417_v8  ;;  %v796_v10 = vpop.f32.mrb[1].mxu0  ;;  %v804_v15 = vpop.f32.mrb[1].mxu1  ;;  %v496_v20 = vadd.f32 %v769_v18, %v495_v14 }
 0x17c   : > { %v420_v11 = vpop.f32.mrb[2].mxu0  ;;  %v498_v16 = vpop.f32.mrb[2].mxu1 }
 0x17d   : > { %v423_v12 = vpack.c.bf16 %v418_v9, %v418_v9  ;;  %v797_v13 = vpop.f32.mrb[3].mxu0  ;;  %v805_v17 = vpop.f32.mrb[3].mxu1  ;;  %v501_v22 = vpack.c.bf16 %v496_v20, %v496_v20 }
 0x17f   : > { %425 = vst.msk [vmem:[#allocation2] sm:$0xf] %vm424_vm2, %v423_v12 }
 0x186   : > { %v502_v19 = vld [vmem:[#allocation2] sm:$0xf] }
 0x187   : > { %v507_v21 = vsel %vm379_vm1, %v502_v19, 0 }
 0x188   : > { %807 = vmatpush3.bf16.xpose.msra.mxu0 %v507_v21 }
 0x18f   : > { %809 = vmatmul.mubr.msk.bf16.vlgmr.msra.gmra.mrb[4].mxu0 %vm379_vm1, %v501_v22 }
 0x262   : > { %v543_v23 = vpop.f32.mrb[4].mxu0 }
 0x263   : > { %v810_v24 = vpop.f32.mrb[5].mxu0  ;;  %v550_v25 = vsel %vm549_vm3, %v543_v23, -inf }
 0x264   : > { %551 = vmax.xlane.f32.xlu0 %v550_v25  ;;  %v546_v26 = vpop.f32.mrb[6].mxu0 }
 0x265   : > { %v811_v27 = vpop.f32.mrb[7].mxu0 }
 0x27a   : > { %429 = vrot.lane.b32.xlu0 %v423_v12, %s1139_s17 }
 0x2f1   : > { %v552_v28 = vpop.xlane.xlu0 %551 }
 0x2f2   : > { %v553_v29 = vsub.f32 %v543_v23, %v552_v28 }
 0x2f4   : > { %v554_v30 = vmul.f32 1.442695, %v553_v29 }
 0x2f5   : > { %v430_v31 = vpop.permute.xlu0 %429 }
 0x2f6   : > { %915 = vpow2.f32 %v554_v30  ;;  %432 = vst.msk [vmem:[#allocation3] sm:$0xf] %vm424_vm2, %v430_v31 }
 0x2fd   : > { %v560_v32 = vld [vmem:[#allocation3] sm:$0xf] }
 0x2fe   : > { %v566_v33 = vsel %vm564_vm4, %v560_v32, 0 }
 0x2ff   : > { %813 = vmatpush3.bf16.msra.mxu1 %v566_v33 }
 0x300   : > { %v916_v34 = vpop.eup %915 }
 0x301   : > { %v556_v35 = vsel %vm549_vm3, %v916_v34, 0.0  ;;  %v559_v36 = vpack.c.bf16 %v916_v34, %v916_v34 }
 0x302   : > { %557 = vadd.xlane.f32.xlu1 %v556_v35 }
 0x303   : > { %815 = vmatmul.mubr.msk.bf16.vlgmr.msra.gmra.mrb[4].mxu1 %vm549_vm3, %v559_v36 }
 0x38f   : > { %v558_v37 = vpop.xlane.xlu1 %557 }
 0x390   : > { %917 = vrcp.f32 %v558_v37 }
 0x39a   : > { %v918_v38 = vpop.eup %917 }
 0x3d6   : > { %v602_v39 = vpop.f32.mrb[4].mxu1 }
 0x3d7   : > { %v609_v40 = vmul.f32 %v918_v38, %v602_v39  ;;  %v816_v41 = vpop.f32.mrb[5].mxu1 }
 0x3d8   : > { %v605_v42 = vpop.f32.mrb[6].mxu1 }
 0x3d9   : > { %v817_v43 = vpop.f32.mrb[7].mxu1  ;;  %610 = vst.msk [vmem:[%s349_s25] sm:$0xff] %vm379_vm1, %v609_v40 }
 0x3da   : > { %1048 = shalt.err (!%p1045_p7)
}
 0x3db   : > { %s1049_s2 = scalar_lea.hbm %s1434_s19, 128  ;;  %s1053_s27 = scalar_lea.hbm %s1490_s6, 256 }
 0x3dc   : > { %p1050_p13 = scmp.ne.s32.totalorder %s1434_s19, %s1049_s2  ;;  %p1054_p2 = scmp.lt.u32.totalorder %s1434_s19, %s1490_s6 }
 0x3dd   : > { %p1055_p12 = scmp.lt.u32.totalorder %s1053_s27, %s1049_s2  ;;  %p1057_p1 = scmp.lt.u32.totalorder %s1049_s2, %s1434_s19 }
 0x3de   : > { %p1051_p8 = pnand %p1050_p13, %p1517_p6 }
 0x3df   : > { %p1056_p0 = por %p1055_p12, %p1054_p2 }
 0x3e0   : > { %p1052_p11 = pneg %p1051_p8 }
 0x3e1   : > { %p1058_p10 = por %p1057_p1, %p1056_p0 }
 0x3e3   : > { %p1059_p3 = pnand %p1058_p10, %p1052_p11 }
 0x3e5   : > { %1062 = shalt.err (!%p1059_p3)
}
 0x3e6   : > { %830 = dma.vmem_to_hbm [thread:$0]  (%p1517_p6), %s1436_s12, 128, %s1434_s19, %s612_s24  }
 0x3e7 PF: > { %s638_s15 = sand.u32 1, %s1109_s21   ;;  %p1518_p4 = scmp.ne.s32.totalorder %s1501_s30, 0 }
 0x3e8   : > { %p1519_p9 = scmp.ge.s32.totalorder %s1129_s26, 2  ;;  %s639_s17 = scalar_lea.sflag [#allocation6], %s638_s15 }
 0x3ea   : > { %p847_p5 = pnand %p1519_p9, %p1518_p4 }
 0x3ec   : > { %1104 = dma.done.wait (!%p847_p5), %s639_s17, 128  }
 0x3ed   : > { %1106 = vsyncadd (!%p847_p5), %s639_s17, 4294967168  ;;  %s26_s26 = sadd.s32 1, %s1129_s26   ;;  %s1520_s10 = sld [smem:[#allocation20_spill]] }
 0x3ee   : > { %p23_p7 = scmp.ge.s32.totalorder %s26_s26, 4   ;;  %s1521_s24 = sld [smem:[#allocation18_spill]] }
 0x3ef   : > { %s1522_s25 = sld [smem:[#allocation19_spill]]  ;;  %s1523_s21 = smov %s1113_s22 }
 0x3f0   : > { %s1524_s22 = smov %s1117_s23  ;;  %25 = sbr.rel (!%p23_p7) target bundleno = 12 (0xc), region = 114 }
 0x3f3   : > { %s1525_s23 = smov %s1520_s10 }
 0x3f7   :  { %644 = vsyncpa [#allocation5], 1 }
 0x3f8   :  { %646 = vsyncpa [#allocation5 + $0x1], 1 }
 0x3f9   :  { %647 = vsyncpa [#allocation8], 1 }
 0x3fa   :  { %649 = vsyncpa [#allocation8 + $0x1], 1 }
 0x3fb   :  { %650 = vsyncpa [#allocation11], 1 }
 0x3fc   :  { %651 = vsyncpa [#allocation6], 1 }
 0x3fd   :  { %653 = vsyncpa [#allocation6 + $0x1], 1 }

</bundles_post_ra>
